<compile_context>
chip_gen: v5e
topology: v5e:2x2
jax: 0.10.0
libtpu: 0.0.40
codegen_flags: <defaults>
</compile_context>

<pallas_src>
import functools

import jax
import jax.numpy as jnp
from jax.experimental import pallas as pl
from jax.experimental.pallas import tpu as pltpu

LN_EPS = 1e-5

# Dtype of the weight operands fed to the MXU.  bf16 on v6e/v7x doubles MXU
# throughput (accumulation stays f32 via preferred_element_type); kept f32 to
# stay numerically faithful to the PyTorch module.
MATMUL_DTYPE = jnp.float32


def _dot32(a, b):
    """MXU matmul with f32 accumulation; lhs cast to the weight dtype."""
    return jnp.dot(a.astype(b.dtype), b, preferred_element_type=jnp.float32)


# ----------------------------------------------------------------------------
# Fused whole-model kernel
# ----------------------------------------------------------------------------
def fused_ssm_kernel(
    u_ref,      # (bt, L, F_in)        raw model input (batch tile)
    ew_ref,     # (F_in, H)            expand weight, pre-transposed (in, out)
    eb_ref,     # (1, H)               expand bias
    gamma_ref,  # (NB, 1, H)           LayerNorm weight per block
    beta_ref,   # (NB, 1, H)           LayerNorm bias per block
    k3_ref,     # (NB, L, L, H)        causal conv taps: k3[s,t,h]=C A^{t-s} B (+D at t==s)
    mw_ref,     # (NB, H, H)           mix weight per block, pre-transposed
    mb_ref,     # (NB, 1, H)           mix bias per block
    ow_ref,     # (H, OUT)             output weight, pre-transposed (bias=False)
    out_ref,    # (bt, L, OUT)
):
    bt, seq_len, f_in = u_ref.shape
    feat = ew_ref.shape[1]
    num_blocks = gamma_ref.shape[0]

    # ---- expand projection: Linear(input_features -> feature_dim) ----------
    u2 = u_ref[...].reshape(bt * seq_len, f_in)
    a = (_dot32(u2, ew_ref[...]) + eb_ref[...]).reshape(bt, seq_len, feat)

    # ---- SSM blocks (static unroll; activation stays on-chip) --------------
    for blk in range(num_blocks):
        # LayerNorm over the feature dim (pre-norm skip = a).
        mean = jnp.mean(a, axis=-1, keepdims=True)
        var = jnp.mean(jnp.square(a - mean), axis=-1, keepdims=True)
        un = (a - mean) * jax.lax.rsqrt(var + LN_EPS)
        un = un * gamma_ref[blk] + beta_ref[blk]            # (bt, L, H)

        # Stacked LSSL layer = per-feature causal time convolution.
        # y[b, t, h] = sum_s un[b, s, h] * k3[s, t, h]   (k3 is lower-triangular
        # in (s, t) with D folded into the diagonal).  L vectorized FMA passes.
        k3b = k3_ref[blk]                                   # (L, L, H)
        y = un[:, 0:1, :] * k3b[0]
        for s in range(1, seq_len):
            y = y + un[:, s:s + 1, :] * k3b[s]

        # mix Linear + SiLU + residual.
        m2 = _dot32(y.reshape(bt * seq_len, feat), mw_ref[blk]) + mb_ref[blk]
        act = m2 * jax.nn.sigmoid(m2)                       # SiLU (EUP)
        a = act.reshape(bt, seq_len, feat) + a

    # ---- output head: Linear(feature_dim -> output_size, bias=False) -------
    o2 = _dot32(a.reshape(bt * seq_len, feat), ow_ref[...])
    out_ref[...] = o2.reshape(bt, seq_len, out_ref.shape[-1]).astype(out_ref.dtype)


# ----------------------------------------------------------------------------
# Pallas wrapper (whole model = one pallas_call)
# ----------------------------------------------------------------------------
def ssm_model_forward(u, params, *, batch_tile=None):
    b, l, f_in = u.shape
    num_blocks, _, feat = params["gamma"].shape
    out_f = params["out_wt"].shape[-1]

    if batch_tile is None:
        batch_tile = b // 2 if (b > 1 and b % 2 == 0) else b
    assert b % batch_tile == 0
    nbt = b // batch_tile
    bt = batch_tile

    return pl.pallas_call(
        fused_ssm_kernel,
        out_shape=jax.ShapeDtypeStruct((b, l, out_f), jnp.float32),
        grid=(nbt,),
        in_specs=[
            pl.BlockSpec((bt, l, f_in), lambda i: (i, 0, 0)),               # u
            pl.BlockSpec((f_in, feat), lambda i: (0, 0)),                   # expand W^T
            pl.BlockSpec((1, feat), lambda i: (0, 0)),                      # expand b
            pl.BlockSpec((num_blocks, 1, feat), lambda i: (0, 0, 0)),       # gamma
            pl.BlockSpec((num_blocks, 1, feat), lambda i: (0, 0, 0)),       # beta
            pl.BlockSpec((num_blocks, l, l, feat), lambda i: (0, 0, 0, 0)), # conv taps
            pl.BlockSpec((num_blocks, feat, feat), lambda i: (0, 0, 0)),    # mix W^T
            pl.BlockSpec((num_blocks, 1, feat), lambda i: (0, 0, 0)),       # mix b
            pl.BlockSpec((feat, out_f), lambda i: (0, 0)),                  # output W^T
        ],
        out_specs=pl.BlockSpec((bt, l, out_f), lambda i: (i, 0, 0)),
        compiler_params=pltpu.CompilerParams(
            dimension_semantics=("parallel",)),
    )(
        u,
        params["expand_wt"], params["expand_b"],
        params["gamma"], params["beta"], params["k3"],
        params["mix_wt"], params["mix_b"],
        params["out_wt"],
    )


# ----------------------------------------------------------------------------
# Deterministic parameter construction (mirrors the PyTorch __init__)
# ----------------------------------------------------------------------------
def hippo(state_dim):
    p = jnp.sqrt(1.0 + 2.0 * jnp.arange(state_dim, dtype=jnp.float32))
    a = p[:, None] * p[None, :]
    a = jnp.tril(a) - jnp.diag(jnp.arange(state_dim, dtype=jnp.float32))
    b = jnp.sqrt(2.0 * jnp.arange(state_dim, dtype=jnp.float32) + 1.0)
    return -a, b[:, None]


def init_block_params(key, feature_dim, state_dim, channels, dt_min, dt_max, seq_len):
    assert channels == 1, "kernel built for channels == 1"
    h, n, l = feature_dim, state_dim, seq_len
    a, b_col = hippo(n)
    eye = jnp.eye(n, dtype=jnp.float32)
    k_dt, k_c, k_w, k_b = jax.random.split(key, 4)

    log_dt = jnp.log(jnp.float32(dt_min)) + jax.random.uniform(
        k_dt, (h,), dtype=jnp.float32
    ) * (jnp.log(jnp.float32(dt_max)) - jnp.log(jnp.float32(dt_min)))
    dts = jnp.exp(log_dt)

    # xavier_normal_ for C of shape (channels, state_dim)
    std = jnp.sqrt(2.0 / (channels + n))
    c_mat = jax.random.normal(k_c, (h, n), dtype=jnp.float32) * std
    d_vec = jnp.ones((h,), jnp.float32)                 # D = ones(channels, 1)

    abar_list, bbar_list, tap_cols = [], [], []
    for i in range(h):
        bl = jnp.linalg.inv(eye - dts[i] / 2.0 * a)
        a_bar = bl @ (eye + dts[i] / 2.0 * a)
        b_bar = (dts[i] * (bl @ b_col))[:, 0]           # (N,)
        abar_list.append(a_bar)
        bbar_list.append(b_bar)
        # causal conv taps: tap[d] = C_i @ A_bar^d @ B_bar  (parameter-only,
        # same precompute spirit as the module's own A_bar_pow)
        taps, v = [], b_bar
        for _ in range(l):
            taps.append(jnp.dot(c_mat[i], v))
            v = a_bar @ v
        tap_cols.append(jnp.stack(taps))                # (L,)

    kmat = jnp.stack(tap_cols, axis=1)                  # (L_lag, H)
    kmat = kmat.at[0].add(d_vec)                        # fold D into lag 0
    lag = jnp.arange(l)[None, :] - jnp.arange(l)[:, None]   # lag[s, t] = t - s
    k3 = jnp.where(lag[:, :, None] >= 0,
                   kmat[jnp.clip(lag, 0, l - 1)], 0.0)  # (L, L, H), causal

    # mix: nn.Linear(feature_dim * channels, feature_dim) default init
    bound = 1.0 / jnp.sqrt(jnp.float32(h * channels))
    mix_w = jax.random.uniform(k_w, (h, h * channels), jnp.float32, -bound, bound)
    mix_b = jax.random.uniform(k_b, (1, h), jnp.float32, -bound, bound)

    return dict(
        gamma=jnp.ones((1, h), jnp.float32),
        beta=jnp.zeros((1, h), jnp.float32),
        k3=k3.astype(jnp.float32),
        mix_wt=mix_w.T.astype(MATMUL_DTYPE),
        mix_b=mix_b,
        # raw discretized SSM parameters — used only by the pure-JAX reference
        ref_abar=jnp.stack(abar_list),                  # (H, N, N)
        ref_bbar=jnp.stack(bbar_list),                  # (H, N)
        ref_c=c_mat,                                    # (H, N)
        ref_d=d_vec,                                    # (H,)
    )


def init_model_params(key, num_blocks, feature_dim, state_dim, channels,
                      input_features, output_size, dt_min, dt_max, seq_len):
    keys = jax.random.split(key, num_blocks + 2)
    blocks = [
        init_block_params(keys[i], feature_dim, state_dim, channels,
                          dt_min, dt_max, seq_len)
        for i in range(num_blocks)
    ]
    stacked = {k: jnp.stack([blk[k] for blk in blocks], axis=0) for k in blocks[0]}

    # expand: nn.Linear(input_features, feature_dim)
    bnd_e = 1.0 / jnp.sqrt(jnp.float32(input_features))
    k_e1, k_e2 = jax.random.split(keys[num_blocks])
    expand_w = jax.random.uniform(
        k_e1, (feature_dim, input_features), jnp.float32, -bnd_e, bnd_e)
    expand_b = jax.random.uniform(k_e2, (1, feature_dim), jnp.float32, -bnd_e, bnd_e)
    # output: nn.Linear(feature_dim, output_size, bias=False)
    bnd_o = 1.0 / jnp.sqrt(jnp.float32(feature_dim))
    out_w = jax.random.uniform(
        keys[num_blocks + 1], (output_size, feature_dim), jnp.float32, -bnd_o, bnd_o)

    # TODO(synk): config.embedding=True path (token-id embedding gather) not
    # implemented; this script uses the `expand` linear path (embedding=False).
    stacked.update(
        expand_wt=expand_w.T.astype(MATMUL_DTYPE),
        expand_b=expand_b,
        out_wt=out_w.T.astype(MATMUL_DTYPE),
    )
    return stacked


# ----------------------------------------------------------------------------
# Pure-JAX reference: mirrors the PyTorch eval-mode serial recurrence exactly
# ----------------------------------------------------------------------------
def ssm_model_reference(u, p):
    b, l, _ = u.shape
    a = u @ p["expand_wt"] + p["expand_b"]
    num_blocks = p["gamma"].shape[0]
    for blk in range(num_blocks):
        mean = a.mean(-1, keepdims=True)
        var = ((a - mean) ** 2).mean(-1, keepdims=True)
        un = (a - mean) / jnp.sqrt(var + LN_EPS) * p["gamma"][blk] + p["beta"][blk]
        a_bar = p["ref_abar"][blk]
        b_bar = p["ref_bbar"][blk]
        c_mat = p["ref_c"][blk]
        d_vec = p["ref_d"][blk]
        x = jnp.zeros((b, a_bar.shape[0], a_bar.shape[-1]), jnp.float32)
        ys = []
        for t in range(l):
            x = jnp.einsum("bhn,hmn->bhm", x, a_bar) + un[:, t, :, None] * b_bar
            ys.append(jnp.einsum("bhn,hn->bh", x, c_mat) + un[:, t, :] * d_vec)
        y = jnp.stack(ys, axis=1)                          # (b, l, H)
        m = y @ p["mix_wt"][blk] + p["mix_b"][blk]
        a = m * jax.nn.sigmoid(m) + a
    return a @ p["out_wt"]


# ----------------------------------------------------------------------------
if __name__ == "__main__":
    # config: batch=2, sequence_length=8, input_features=4, feature_dim=32,
    #         state_dim=16, channels=1, num_blocks=2, output_size=10,
    #         dropout_p=0.0, dt_min=1e-3, dt_max=1e-1, embedding=False
    B, L, IN_F = 2, 8, 4
    FEAT, STATE, CH = 32, 16, 1
    NUM_BLOCKS, OUT = 2, 10

    key = jax.random.PRNGKey(0)
    k_x, k_p = jax.random.split(key)
    u = jax.random.normal(k_x, (B, L, IN_F), dtype=jnp.float32)
    params = init_model_params(
        k_p, NUM_BLOCKS, FEAT, STATE, CH, IN_F, OUT,
        dt_min=1e-3, dt_max=1e-1, seq_len=L,
    )

    # batch_tile=1 -> 2 batch tiles on the "parallel" grid axis (v7x megacore).
    fwd = jax.jit(functools.partial(ssm_model_forward, batch_tile=1))
    out = jax.block_until_ready(fwd(u, params))

    assert out.shape == (B, L, OUT)
    assert bool(jnp.all(jnp.isfinite(out)))

    # Correctness vs the eval-mode recurrence (loose tol covers MXU-pass
    # precision differences between XLA and Mosaic f32 matmuls; typical
    # observed deviation is ~1e-4).
    ref = jax.block_until_ready(ssm_model_reference(u, params))
    assert bool(jnp.allclose(out, ref, atol=2e-2, rtol=2e-2))

    print("KERNEL_OK")
</pallas_src>

<mosaic_0001>
module attributes {stable_mosaic.version = 11 : i64} {
  func.func @fused_ssm_kernel(%arg0: i32, %arg1: memref<1x8x4xf32, #tpu.memory_space<vmem>>, %arg2: memref<4x32xf32, #tpu.memory_space<vmem>>, %arg3: memref<1x32xf32, #tpu.memory_space<vmem>>, %arg4: memref<2x1x32xf32, #tpu.memory_space<vmem>>, %arg5: memref<2x1x32xf32, #tpu.memory_space<vmem>>, %arg6: memref<2x8x8x32xf32, #tpu.memory_space<vmem>>, %arg7: memref<2x32x32xf32, #tpu.memory_space<vmem>>, %arg8: memref<2x1x32xf32, #tpu.memory_space<vmem>>, %arg9: memref<32x10xf32, #tpu.memory_space<vmem>>, %arg10: memref<1x8x10xf32, #tpu.memory_space<vmem>>) attributes {dimension_semantics = [#tpu.dimension_semantics<parallel>], iteration_bounds = array<i64: 2>, scalar_prefetch = 0 : i64, scratch_operands = 0 : i64, tpu.core_type = #tpu.core_type<tc>, window_params = [{transform_indices = @transform_0, window_bounds = array<i64: 1, 8, 4>}, {pipeline_mode = #tpu.pipeline_mode<synchronous>, transform_indices = @transform_1, window_bounds = array<i64: 4, 32>}, {pipeline_mode = #tpu.pipeline_mode<synchronous>, transform_indices = @transform_2, window_bounds = array<i64: 1, 32>}, {pipeline_mode = #tpu.pipeline_mode<synchronous>, transform_indices = @transform_3, window_bounds = array<i64: 2, 1, 32>}, {pipeline_mode = #tpu.pipeline_mode<synchronous>, transform_indices = @transform_4, window_bounds = array<i64: 2, 1, 32>}, {pipeline_mode = #tpu.pipeline_mode<synchronous>, transform_indices = @transform_5, window_bounds = array<i64: 2, 8, 8, 32>}, {pipeline_mode = #tpu.pipeline_mode<synchronous>, transform_indices = @transform_6, window_bounds = array<i64: 2, 32, 32>}, {pipeline_mode = #tpu.pipeline_mode<synchronous>, transform_indices = @transform_7, window_bounds = array<i64: 2, 1, 32>}, {pipeline_mode = #tpu.pipeline_mode<synchronous>, transform_indices = @transform_8, window_bounds = array<i64: 32, 10>}, {transform_indices = @transform_9, window_bounds = array<i64: 1, 8, 10>}]} {
    %c0 = arith.constant 0 : index
    %c0_0 = arith.constant 0 : index
    %c0_1 = arith.constant 0 : index
    %0 = vector.load %arg1[%c0, %c0_0, %c0_1] : memref<1x8x4xf32, #tpu.memory_space<vmem>>, vector<1x8x4xf32>
    %1 = vector.shape_cast %0 : vector<1x8x4xf32> to vector<8x4xf32>
    %c0_2 = arith.constant 0 : index
    %c0_3 = arith.constant 0 : index
    %2 = vector.load %arg2[%c0_2, %c0_3] : memref<4x32xf32, #tpu.memory_space<vmem>>, vector<4x32xf32>
    %cst = arith.constant dense<0.000000e+00> : vector<8x32xf32>
    %3 = tpu.matmul %1, %2, %cst {dimension_numbers = #tpu.dot_dimension_numbers<[1], [0], [0], [1], [0, 0, 1, 1], [], []>} : vector<8x4xf32>, vector<4x32xf32>, vector<8x32xf32> -> vector<8x32xf32>
    %c0_4 = arith.constant 0 : index
    %c0_5 = arith.constant 0 : index
    %4 = vector.load %arg3[%c0_4, %c0_5] : memref<1x32xf32, #tpu.memory_space<vmem>>, vector<1x32xf32>
    %5 = vector.broadcast %4 : vector<1x32xf32> to vector<8x32xf32>
    %6 = arith.addf %3, %5 : vector<8x32xf32>
    %7 = vector.shape_cast %6 : vector<8x32xf32> to vector<1x8x32xf32>
    %cst_6 = arith.constant dense<0.000000e+00> : vector<1x8xf32>
    %8 = vector.multi_reduction <add>, %7, %cst_6 [2] : vector<1x8x32xf32> to vector<1x8xf32>
    %9 = vector.shape_cast %8 : vector<1x8xf32> to vector<1x8x1xf32>
    %cst_7 = arith.constant 3.200000e+01 : f32
    %10 = vector.broadcast %cst_7 : f32 to vector<1x8x1xf32>
    %11 = arith.divf %9, %10 : vector<1x8x1xf32>
    %12 = vector.broadcast %11 : vector<1x8x1xf32> to vector<1x8x32xf32>
    %13 = arith.subf %7, %12 : vector<1x8x32xf32>
    %14 = arith.mulf %13, %13 : vector<1x8x32xf32>
    %cst_8 = arith.constant dense<0.000000e+00> : vector<1x8xf32>
    %15 = vector.multi_reduction <add>, %14, %cst_8 [2] : vector<1x8x32xf32> to vector<1x8xf32>
    %16 = vector.shape_cast %15 : vector<1x8xf32> to vector<1x8x1xf32>
    %cst_9 = arith.constant 3.200000e+01 : f32
    %17 = vector.broadcast %cst_9 : f32 to vector<1x8x1xf32>
    %18 = arith.divf %16, %17 : vector<1x8x1xf32>
    %19 = vector.broadcast %11 : vector<1x8x1xf32> to vector<1x8x32xf32>
    %20 = arith.subf %7, %19 : vector<1x8x32xf32>
    %cst_10 = arith.constant 9.99999974E-6 : f32
    %21 = vector.broadcast %cst_10 : f32 to vector<1x8x1xf32>
    %22 = arith.addf %18, %21 : vector<1x8x1xf32>
    %23 = math.rsqrt %22 : vector<1x8x1xf32>
    %24 = vector.broadcast %23 : vector<1x8x1xf32> to vector<1x8x32xf32>
    %25 = arith.mulf %20, %24 : vector<1x8x32xf32>
    %c0_11 = arith.constant 0 : index
    %c0_12 = arith.constant 0 : index
    %c0_13 = arith.constant 0 : index
    %26 = vector.load %arg4[%c0_11, %c0_12, %c0_13] : memref<2x1x32xf32, #tpu.memory_space<vmem>>, vector<1x1x32xf32>
    %27 = vector.shape_cast %26 : vector<1x1x32xf32> to vector<1x32xf32>
    %28 = vector.shape_cast %27 : vector<1x32xf32> to vector<1x1x32xf32>
    %29 = vector.broadcast %28 : vector<1x1x32xf32> to vector<1x8x32xf32>
    %30 = arith.mulf %25, %29 : vector<1x8x32xf32>
    %c0_14 = arith.constant 0 : index
    %c0_15 = arith.constant 0 : index
    %c0_16 = arith.constant 0 : index
    %31 = vector.load %arg5[%c0_14, %c0_15, %c0_16] : memref<2x1x32xf32, #tpu.memory_space<vmem>>, vector<1x1x32xf32>
    %32 = vector.shape_cast %31 : vector<1x1x32xf32> to vector<1x32xf32>
    %33 = vector.shape_cast %32 : vector<1x32xf32> to vector<1x1x32xf32>
    %34 = vector.broadcast %33 : vector<1x1x32xf32> to vector<1x8x32xf32>
    %35 = arith.addf %30, %34 : vector<1x8x32xf32>
    %c0_17 = arith.constant 0 : index
    %c0_18 = arith.constant 0 : index
    %c0_19 = arith.constant 0 : index
    %c0_20 = arith.constant 0 : index
    %36 = vector.load %arg6[%c0_17, %c0_18, %c0_19, %c0_20] : memref<2x8x8x32xf32, #tpu.memory_space<vmem>>, vector<1x8x8x32xf32>
    %37 = vector.shape_cast %36 : vector<1x8x8x32xf32> to vector<8x8x32xf32>
    %38 = vector.extract_strided_slice %35 {offsets = [0, 0, 0], sizes = [1, 1, 32], strides = [1, 1, 1]} : vector<1x8x32xf32> to vector<1x1x32xf32>
    %39 = vector.extract_strided_slice %37 {offsets = [0, 0, 0], sizes = [1, 8, 32], strides = [1, 1, 1]} : vector<8x8x32xf32> to vector<1x8x32xf32>
    %40 = vector.shape_cast %39 : vector<1x8x32xf32> to vector<8x32xf32>
    %41 = vector.shape_cast %40 : vector<8x32xf32> to vector<1x8x32xf32>
    %42 = vector.broadcast %38 : vector<1x1x32xf32> to vector<1x8x32xf32>
    %43 = arith.mulf %42, %41 : vector<1x8x32xf32>
    %44 = vector.extract_strided_slice %35 {offsets = [0, 1, 0], sizes = [1, 1, 32], strides = [1, 1, 1]} : vector<1x8x32xf32> to vector<1x1x32xf32>
    %45 = vector.extract_strided_slice %37 {offsets = [1, 0, 0], sizes = [1, 8, 32], strides = [1, 1, 1]} : vector<8x8x32xf32> to vector<1x8x32xf32>
    %46 = vector.shape_cast %45 : vector<1x8x32xf32> to vector<8x32xf32>
    %47 = vector.shape_cast %46 : vector<8x32xf32> to vector<1x8x32xf32>
    %48 = vector.broadcast %44 : vector<1x1x32xf32> to vector<1x8x32xf32>
    %49 = arith.mulf %48, %47 : vector<1x8x32xf32>
    %50 = arith.addf %43, %49 : vector<1x8x32xf32>
    %51 = vector.extract_strided_slice %35 {offsets = [0, 2, 0], sizes = [1, 1, 32], strides = [1, 1, 1]} : vector<1x8x32xf32> to vector<1x1x32xf32>
    %52 = vector.extract_strided_slice %37 {offsets = [2, 0, 0], sizes = [1, 8, 32], strides = [1, 1, 1]} : vector<8x8x32xf32> to vector<1x8x32xf32>
    %53 = vector.shape_cast %52 : vector<1x8x32xf32> to vector<8x32xf32>
    %54 = vector.shape_cast %53 : vector<8x32xf32> to vector<1x8x32xf32>
    %55 = vector.broadcast %51 : vector<1x1x32xf32> to vector<1x8x32xf32>
    %56 = arith.mulf %55, %54 : vector<1x8x32xf32>
    %57 = arith.addf %50, %56 : vector<1x8x32xf32>
    %58 = vector.extract_strided_slice %35 {offsets = [0, 3, 0], sizes = [1, 1, 32], strides = [1, 1, 1]} : vector<1x8x32xf32> to vector<1x1x32xf32>
    %59 = vector.extract_strided_slice %37 {offsets = [3, 0, 0], sizes = [1, 8, 32], strides = [1, 1, 1]} : vector<8x8x32xf32> to vector<1x8x32xf32>
    %60 = vector.shape_cast %59 : vector<1x8x32xf32> to vector<8x32xf32>
    %61 = vector.shape_cast %60 : vector<8x32xf32> to vector<1x8x32xf32>
    %62 = vector.broadcast %58 : vector<1x1x32xf32> to vector<1x8x32xf32>
    %63 = arith.mulf %62, %61 : vector<1x8x32xf32>
    %64 = arith.addf %57, %63 : vector<1x8x32xf32>
    %65 = vector.extract_strided_slice %35 {offsets = [0, 4, 0], sizes = [1, 1, 32], strides = [1, 1, 1]} : vector<1x8x32xf32> to vector<1x1x32xf32>
    %66 = vector.extract_strided_slice %37 {offsets = [4, 0, 0], sizes = [1, 8, 32], strides = [1, 1, 1]} : vector<8x8x32xf32> to vector<1x8x32xf32>
    %67 = vector.shape_cast %66 : vector<1x8x32xf32> to vector<8x32xf32>
    %68 = vector.shape_cast %67 : vector<8x32xf32> to vector<1x8x32xf32>
    %69 = vector.broadcast %65 : vector<1x1x32xf32> to vector<1x8x32xf32>
    %70 = arith.mulf %69, %68 : vector<1x8x32xf32>
    %71 = arith.addf %64, %70 : vector<1x8x32xf32>
    %72 = vector.extract_strided_slice %35 {offsets = [0, 5, 0], sizes = [1, 1, 32], strides = [1, 1, 1]} : vector<1x8x32xf32> to vector<1x1x32xf32>
    %73 = vector.extract_strided_slice %37 {offsets = [5, 0, 0], sizes = [1, 8, 32], strides = [1, 1, 1]} : vector<8x8x32xf32> to vector<1x8x32xf32>
    %74 = vector.shape_cast %73 : vector<1x8x32xf32> to vector<8x32xf32>
    %75 = vector.shape_cast %74 : vector<8x32xf32> to vector<1x8x32xf32>
    %76 = vector.broadcast %72 : vector<1x1x32xf32> to vector<1x8x32xf32>
    %77 = arith.mulf %76, %75 : vector<1x8x32xf32>
    %78 = arith.addf %71, %77 : vector<1x8x32xf32>
    %79 = vector.extract_strided_slice %35 {offsets = [0, 6, 0], sizes = [1, 1, 32], strides = [1, 1, 1]} : vector<1x8x32xf32> to vector<1x1x32xf32>
    %80 = vector.extract_strided_slice %37 {offsets = [6, 0, 0], sizes = [1, 8, 32], strides = [1, 1, 1]} : vector<8x8x32xf32> to vector<1x8x32xf32>
    %81 = vector.shape_cast %80 : vector<1x8x32xf32> to vector<8x32xf32>
    %82 = vector.shape_cast %81 : vector<8x32xf32> to vector<1x8x32xf32>
    %83 = vector.broadcast %79 : vector<1x1x32xf32> to vector<1x8x32xf32>
    %84 = arith.mulf %83, %82 : vector<1x8x32xf32>
    %85 = arith.addf %78, %84 : vector<1x8x32xf32>
    %86 = vector.extract_strided_slice %35 {offsets = [0, 7, 0], sizes = [1, 1, 32], strides = [1, 1, 1]} : vector<1x8x32xf32> to vector<1x1x32xf32>
    %87 = vector.extract_strided_slice %37 {offsets = [7, 0, 0], sizes = [1, 8, 32], strides = [1, 1, 1]} : vector<8x8x32xf32> to vector<1x8x32xf32>
    %88 = vector.shape_cast %87 : vector<1x8x32xf32> to vector<8x32xf32>
    %89 = vector.shape_cast %88 : vector<8x32xf32> to vector<1x8x32xf32>
    %90 = vector.broadcast %86 : vector<1x1x32xf32> to vector<1x8x32xf32>
    %91 = arith.mulf %90, %89 : vector<1x8x32xf32>
    %92 = arith.addf %85, %91 : vector<1x8x32xf32>
    %93 = vector.shape_cast %92 : vector<1x8x32xf32> to vector<8x32xf32>
    %c0_21 = arith.constant 0 : index
    %c0_22 = arith.constant 0 : index
    %c0_23 = arith.constant 0 : index
    %94 = vector.load %arg7[%c0_21, %c0_22, %c0_23] : memref<2x32x32xf32, #tpu.memory_space<vmem>>, vector<1x32x32xf32>
    %95 = vector.shape_cast %94 : vector<1x32x32xf32> to vector<32x32xf32>
    %cst_24 = arith.constant dense<0.000000e+00> : vector<8x32xf32>
    %96 = tpu.matmul %93, %95, %cst_24 {dimension_numbers = #tpu.dot_dimension_numbers<[1], [0], [0], [1], [0, 0, 1, 1], [], []>} : vector<8x32xf32>, vector<32x32xf32>, vector<8x32xf32> -> vector<8x32xf32>
    %c0_25 = arith.constant 0 : index
    %c0_26 = arith.constant 0 : index
    %c0_27 = arith.constant 0 : index
    %97 = vector.load %arg8[%c0_25, %c0_26, %c0_27] : memref<2x1x32xf32, #tpu.memory_space<vmem>>, vector<1x1x32xf32>
    %98 = vector.shape_cast %97 : vector<1x1x32xf32> to vector<1x32xf32>
    %99 = vector.broadcast %98 : vector<1x32xf32> to vector<8x32xf32>
    %100 = arith.addf %96, %99 : vector<8x32xf32>
    %101 = arith.negf %100 : vector<8x32xf32>
    %102 = math.exp %101 : vector<8x32xf32>
    %cst_28 = arith.constant 1.000000e+00 : f32
    %103 = vector.broadcast %cst_28 : f32 to vector<8x32xf32>
    %104 = arith.addf %103, %102 : vector<8x32xf32>
    %105 = arith.divf %103, %104 : vector<8x32xf32>
    %106 = arith.mulf %100, %105 : vector<8x32xf32>
    %107 = vector.shape_cast %106 : vector<8x32xf32> to vector<1x8x32xf32>
    %108 = arith.addf %107, %7 : vector<1x8x32xf32>
    %cst_29 = arith.constant dense<0.000000e+00> : vector<1x8xf32>
    %109 = vector.multi_reduction <add>, %108, %cst_29 [2] : vector<1x8x32xf32> to vector<1x8xf32>
    %110 = vector.shape_cast %109 : vector<1x8xf32> to vector<1x8x1xf32>
    %cst_30 = arith.constant 3.200000e+01 : f32
    %111 = vector.broadcast %cst_30 : f32 to vector<1x8x1xf32>
    %112 = arith.divf %110, %111 : vector<1x8x1xf32>
    %113 = vector.broadcast %112 : vector<1x8x1xf32> to vector<1x8x32xf32>
    %114 = arith.subf %108, %113 : vector<1x8x32xf32>
    %115 = arith.mulf %114, %114 : vector<1x8x32xf32>
    %cst_31 = arith.constant dense<0.000000e+00> : vector<1x8xf32>
    %116 = vector.multi_reduction <add>, %115, %cst_31 [2] : vector<1x8x32xf32> to vector<1x8xf32>
    %117 = vector.shape_cast %116 : vector<1x8xf32> to vector<1x8x1xf32>
    %cst_32 = arith.constant 3.200000e+01 : f32
    %118 = vector.broadcast %cst_32 : f32 to vector<1x8x1xf32>
    %119 = arith.divf %117, %118 : vector<1x8x1xf32>
    %120 = vector.broadcast %112 : vector<1x8x1xf32> to vector<1x8x32xf32>
    %121 = arith.subf %108, %120 : vector<1x8x32xf32>
    %cst_33 = arith.constant 9.99999974E-6 : f32
    %122 = vector.broadcast %cst_33 : f32 to vector<1x8x1xf32>
    %123 = arith.addf %119, %122 : vector<1x8x1xf32>
    %124 = math.rsqrt %123 : vector<1x8x1xf32>
    %125 = vector.broadcast %124 : vector<1x8x1xf32> to vector<1x8x32xf32>
    %126 = arith.mulf %121, %125 : vector<1x8x32xf32>
    %c1 = arith.constant 1 : index
    %c0_34 = arith.constant 0 : index
    %c0_35 = arith.constant 0 : index
    %127 = vector.load %arg4[%c1, %c0_34, %c0_35] : memref<2x1x32xf32, #tpu.memory_space<vmem>>, vector<1x1x32xf32>
    %128 = vector.shape_cast %127 : vector<1x1x32xf32> to vector<1x32xf32>
    %129 = vector.shape_cast %128 : vector<1x32xf32> to vector<1x1x32xf32>
    %130 = vector.broadcast %129 : vector<1x1x32xf32> to vector<1x8x32xf32>
    %131 = arith.mulf %126, %130 : vector<1x8x32xf32>
    %c1_36 = arith.constant 1 : index
    %c0_37 = arith.constant 0 : index
    %c0_38 = arith.constant 0 : index
    %132 = vector.load %arg5[%c1_36, %c0_37, %c0_38] : memref<2x1x32xf32, #tpu.memory_space<vmem>>, vector<1x1x32xf32>
    %133 = vector.shape_cast %132 : vector<1x1x32xf32> to vector<1x32xf32>
    %134 = vector.shape_cast %133 : vector<1x32xf32> to vector<1x1x32xf32>
    %135 = vector.broadcast %134 : vector<1x1x32xf32> to vector<1x8x32xf32>
    %136 = arith.addf %131, %135 : vector<1x8x32xf32>
    %c1_39 = arith.constant 1 : index
    %c0_40 = arith.constant 0 : index
    %c0_41 = arith.constant 0 : index
    %c0_42 = arith.constant 0 : index
    %137 = vector.load %arg6[%c1_39, %c0_40, %c0_41, %c0_42] : memref<2x8x8x32xf32, #tpu.memory_space<vmem>>, vector<1x8x8x32xf32>
    %138 = vector.shape_cast %137 : vector<1x8x8x32xf32> to vector<8x8x32xf32>
    %139 = vector.extract_strided_slice %136 {offsets = [0, 0, 0], sizes = [1, 1, 32], strides = [1, 1, 1]} : vector<1x8x32xf32> to vector<1x1x32xf32>
    %140 = vector.extract_strided_slice %138 {offsets = [0, 0, 0], sizes = [1, 8, 32], strides = [1, 1, 1]} : vector<8x8x32xf32> to vector<1x8x32xf32>
    %141 = vector.shape_cast %140 : vector<1x8x32xf32> to vector<8x32xf32>
    %142 = vector.shape_cast %141 : vector<8x32xf32> to vector<1x8x32xf32>
    %143 = vector.broadcast %139 : vector<1x1x32xf32> to vector<1x8x32xf32>
    %144 = arith.mulf %143, %142 : vector<1x8x32xf32>
    %145 = vector.extract_strided_slice %136 {offsets = [0, 1, 0], sizes = [1, 1, 32], strides = [1, 1, 1]} : vector<1x8x32xf32> to vector<1x1x32xf32>
    %146 = vector.extract_strided_slice %138 {offsets = [1, 0, 0], sizes = [1, 8, 32], strides = [1, 1, 1]} : vector<8x8x32xf32> to vector<1x8x32xf32>
    %147 = vector.shape_cast %146 : vector<1x8x32xf32> to vector<8x32xf32>
    %148 = vector.shape_cast %147 : vector<8x32xf32> to vector<1x8x32xf32>
    %149 = vector.broadcast %145 : vector<1x1x32xf32> to vector<1x8x32xf32>
    %150 = arith.mulf %149, %148 : vector<1x8x32xf32>
    %151 = arith.addf %144, %150 : vector<1x8x32xf32>
    %152 = vector.extract_strided_slice %136 {offsets = [0, 2, 0], sizes = [1, 1, 32], strides = [1, 1, 1]} : vector<1x8x32xf32> to vector<1x1x32xf32>
    %153 = vector.extract_strided_slice %138 {offsets = [2, 0, 0], sizes = [1, 8, 32], strides = [1, 1, 1]} : vector<8x8x32xf32> to vector<1x8x32xf32>
    %154 = vector.shape_cast %153 : vector<1x8x32xf32> to vector<8x32xf32>
    %155 = vector.shape_cast %154 : vector<8x32xf32> to vector<1x8x32xf32>
    %156 = vector.broadcast %152 : vector<1x1x32xf32> to vector<1x8x32xf32>
    %157 = arith.mulf %156, %155 : vector<1x8x32xf32>
    %158 = arith.addf %151, %157 : vector<1x8x32xf32>
    %159 = vector.extract_strided_slice %136 {offsets = [0, 3, 0], sizes = [1, 1, 32], strides = [1, 1, 1]} : vector<1x8x32xf32> to vector<1x1x32xf32>
    %160 = vector.extract_strided_slice %138 {offsets = [3, 0, 0], sizes = [1, 8, 32], strides = [1, 1, 1]} : vector<8x8x32xf32> to vector<1x8x32xf32>
    %161 = vector.shape_cast %160 : vector<1x8x32xf32> to vector<8x32xf32>
    %162 = vector.shape_cast %161 : vector<8x32xf32> to vector<1x8x32xf32>
    %163 = vector.broadcast %159 : vector<1x1x32xf32> to vector<1x8x32xf32>
    %164 = arith.mulf %163, %162 : vector<1x8x32xf32>
    %165 = arith.addf %158, %164 : vector<1x8x32xf32>
    %166 = vector.extract_strided_slice %136 {offsets = [0, 4, 0], sizes = [1, 1, 32], strides = [1, 1, 1]} : vector<1x8x32xf32> to vector<1x1x32xf32>
    %167 = vector.extract_strided_slice %138 {offsets = [4, 0, 0], sizes = [1, 8, 32], strides = [1, 1, 1]} : vector<8x8x32xf32> to vector<1x8x32xf32>
    %168 = vector.shape_cast %167 : vector<1x8x32xf32> to vector<8x32xf32>
    %169 = vector.shape_cast %168 : vector<8x32xf32> to vector<1x8x32xf32>
    %170 = vector.broadcast %166 : vector<1x1x32xf32> to vector<1x8x32xf32>
    %171 = arith.mulf %170, %169 : vector<1x8x32xf32>
    %172 = arith.addf %165, %171 : vector<1x8x32xf32>
    %173 = vector.extract_strided_slice %136 {offsets = [0, 5, 0], sizes = [1, 1, 32], strides = [1, 1, 1]} : vector<1x8x32xf32> to vector<1x1x32xf32>
    %174 = vector.extract_strided_slice %138 {offsets = [5, 0, 0], sizes = [1, 8, 32], strides = [1, 1, 1]} : vector<8x8x32xf32> to vector<1x8x32xf32>
    %175 = vector.shape_cast %174 : vector<1x8x32xf32> to vector<8x32xf32>
    %176 = vector.shape_cast %175 : vector<8x32xf32> to vector<1x8x32xf32>
    %177 = vector.broadcast %173 : vector<1x1x32xf32> to vector<1x8x32xf32>
    %178 = arith.mulf %177, %176 : vector<1x8x32xf32>
    %179 = arith.addf %172, %178 : vector<1x8x32xf32>
    %180 = vector.extract_strided_slice %136 {offsets = [0, 6, 0], sizes = [1, 1, 32], strides = [1, 1, 1]} : vector<1x8x32xf32> to vector<1x1x32xf32>
    %181 = vector.extract_strided_slice %138 {offsets = [6, 0, 0], sizes = [1, 8, 32], strides = [1, 1, 1]} : vector<8x8x32xf32> to vector<1x8x32xf32>
    %182 = vector.shape_cast %181 : vector<1x8x32xf32> to vector<8x32xf32>
    %183 = vector.shape_cast %182 : vector<8x32xf32> to vector<1x8x32xf32>
    %184 = vector.broadcast %180 : vector<1x1x32xf32> to vector<1x8x32xf32>
    %185 = arith.mulf %184, %183 : vector<1x8x32xf32>
    %186 = arith.addf %179, %185 : vector<1x8x32xf32>
    %187 = vector.extract_strided_slice %136 {offsets = [0, 7, 0], sizes = [1, 1, 32], strides = [1, 1, 1]} : vector<1x8x32xf32> to vector<1x1x32xf32>
    %188 = vector.extract_strided_slice %138 {offsets = [7, 0, 0], sizes = [1, 8, 32], strides = [1, 1, 1]} : vector<8x8x32xf32> to vector<1x8x32xf32>
    %189 = vector.shape_cast %188 : vector<1x8x32xf32> to vector<8x32xf32>
    %190 = vector.shape_cast %189 : vector<8x32xf32> to vector<1x8x32xf32>
    %191 = vector.broadcast %187 : vector<1x1x32xf32> to vector<1x8x32xf32>
    %192 = arith.mulf %191, %190 : vector<1x8x32xf32>
    %193 = arith.addf %186, %192 : vector<1x8x32xf32>
    %194 = vector.shape_cast %193 : vector<1x8x32xf32> to vector<8x32xf32>
    %c1_43 = arith.constant 1 : index
    %c0_44 = arith.constant 0 : index
    %c0_45 = arith.constant 0 : index
    %195 = vector.load %arg7[%c1_43, %c0_44, %c0_45] : memref<2x32x32xf32, #tpu.memory_space<vmem>>, vector<1x32x32xf32>
    %196 = vector.shape_cast %195 : vector<1x32x32xf32> to vector<32x32xf32>
    %cst_46 = arith.constant dense<0.000000e+00> : vector<8x32xf32>
    %197 = tpu.matmul %194, %196, %cst_46 {dimension_numbers = #tpu.dot_dimension_numbers<[1], [0], [0], [1], [0, 0, 1, 1], [], []>} : vector<8x32xf32>, vector<32x32xf32>, vector<8x32xf32> -> vector<8x32xf32>
    %c1_47 = arith.constant 1 : index
    %c0_48 = arith.constant 0 : index
    %c0_49 = arith.constant 0 : index
    %198 = vector.load %arg8[%c1_47, %c0_48, %c0_49] : memref<2x1x32xf32, #tpu.memory_space<vmem>>, vector<1x1x32xf32>
    %199 = vector.shape_cast %198 : vector<1x1x32xf32> to vector<1x32xf32>
    %200 = vector.broadcast %199 : vector<1x32xf32> to vector<8x32xf32>
    %201 = arith.addf %197, %200 : vector<8x32xf32>
    %202 = arith.negf %201 : vector<8x32xf32>
    %203 = math.exp %202 : vector<8x32xf32>
    %cst_50 = arith.constant 1.000000e+00 : f32
    %204 = vector.broadcast %cst_50 : f32 to vector<8x32xf32>
    %205 = arith.addf %204, %203 : vector<8x32xf32>
    %206 = arith.divf %204, %205 : vector<8x32xf32>
    %207 = arith.mulf %201, %206 : vector<8x32xf32>
    %208 = vector.shape_cast %207 : vector<8x32xf32> to vector<1x8x32xf32>
    %209 = arith.addf %208, %108 : vector<1x8x32xf32>
    %210 = vector.shape_cast %209 : vector<1x8x32xf32> to vector<8x32xf32>
    %c0_51 = arith.constant 0 : index
    %c0_52 = arith.constant 0 : index
    %211 = vector.load %arg9[%c0_51, %c0_52] : memref<32x10xf32, #tpu.memory_space<vmem>>, vector<32x10xf32>
    %cst_53 = arith.constant dense<0.000000e+00> : vector<8x10xf32>
    %212 = tpu.matmul %210, %211, %cst_53 {dimension_numbers = #tpu.dot_dimension_numbers<[1], [0], [0], [1], [0, 0, 1, 1], [], []>} : vector<8x32xf32>, vector<32x10xf32>, vector<8x10xf32> -> vector<8x10xf32>
    %213 = vector.shape_cast %212 : vector<8x10xf32> to vector<1x8x10xf32>
    %c0_54 = arith.constant 0 : index
    %c0_55 = arith.constant 0 : index
    %c0_56 = arith.constant 0 : index
    %214 = vector.load %arg10[%c0_54, %c0_55, %c0_56] : memref<1x8x10xf32, #tpu.memory_space<vmem>>, vector<1x8x10xf32>
    tpu.vector_store %arg10[%c0_54, %c0_55, %c0_56], %213 {strides = array<i32>} : memref<1x8x10xf32, #tpu.memory_space<vmem>>, vector<1x8x10xf32>,
    return
  }
  func.func @transform_0(%arg0: i32) -> (i32, i32, i32) {
    %c0_i32 = arith.constant 0 : i32
    %c0_i32_0 = arith.constant 0 : i32
    %c0_i32_1 = arith.constant 0 : i32
    return %arg0, %c0_i32, %c0_i32_0 : i32, i32, i32
  }
  func.func @transform_1(%arg0: i32) -> (i32, i32) {
    %c0_i32 = arith.constant 0 : i32
    %c0_i32_0 = arith.constant 0 : i32
    %c0_i32_1 = arith.constant 0 : i32
    return %c0_i32, %c0_i32_0 : i32, i32
  }
  func.func @transform_2(%arg0: i32) -> (i32, i32) {
    %c0_i32 = arith.constant 0 : i32
    %c0_i32_0 = arith.constant 0 : i32
    %c0_i32_1 = arith.constant 0 : i32
    return %c0_i32, %c0_i32_0 : i32, i32
  }
  func.func @transform_3(%arg0: i32) -> (i32, i32, i32) {
    %c0_i32 = arith.constant 0 : i32
    %c0_i32_0 = arith.constant 0 : i32
    %c0_i32_1 = arith.constant 0 : i32
    %c0_i32_2 = arith.constant 0 : i32
    return %c0_i32, %c0_i32_0, %c0_i32_1 : i32, i32, i32
  }
  func.func @transform_4(%arg0: i32) -> (i32, i32, i32) {
    %c0_i32 = arith.constant 0 : i32
    %c0_i32_0 = arith.constant 0 : i32
    %c0_i32_1 = arith.constant 0 : i32
    %c0_i32_2 = arith.constant 0 : i32
    return %c0_i32, %c0_i32_0, %c0_i32_1 : i32, i32, i32
  }
  func.func @transform_5(%arg0: i32) -> (i32, i32, i32, i32) {
    %c0_i32 = arith.constant 0 : i32
    %c0_i32_0 = arith.constant 0 : i32
    %c0_i32_1 = arith.constant 0 : i32
    %c0_i32_2 = arith.constant 0 : i32
    %c0_i32_3 = arith.constant 0 : i32
    return %c0_i32, %c0_i32_0, %c0_i32_1, %c0_i32_2 : i32, i32, i32, i32
  }
  func.func @transform_6(%arg0: i32) -> (i32, i32, i32) {
    %c0_i32 = arith.constant 0 : i32
    %c0_i32_0 = arith.constant 0 : i32
    %c0_i32_1 = arith.constant 0 : i32
    %c0_i32_2 = arith.constant 0 : i32
    return %c0_i32, %c0_i32_0, %c0_i32_1 : i32, i32, i32
  }
  func.func @transform_7(%arg0: i32) -> (i32, i32, i32) {
    %c0_i32 = arith.constant 0 : i32
    %c0_i32_0 = arith.constant 0 : i32
    %c0_i32_1 = arith.constant 0 : i32
    %c0_i32_2 = arith.constant 0 : i32
    return %c0_i32, %c0_i32_0, %c0_i32_1 : i32, i32, i32
  }
  func.func @transform_8(%arg0: i32) -> (i32, i32) {
    %c0_i32 = arith.constant 0 : i32
    %c0_i32_0 = arith.constant 0 : i32
    %c0_i32_1 = arith.constant 0 : i32
    return %c0_i32, %c0_i32_0 : i32, i32
  }
  func.func @transform_9(%arg0: i32) -> (i32, i32, i32) {
    %c0_i32 = arith.constant 0 : i32
    %c0_i32_0 = arith.constant 0 : i32
    %c0_i32_1 = arith.constant 0 : i32
    return %arg0, %c0_i32, %c0_i32_0 : i32, i32, i32
  }
}

</mosaic_0001>

<bundles_post_ra>
// kernel: ssm_model_forward.1
= control target key start
LH: loop header
LB: loop body
LE: loop exit
PB: predicated region body
PF: predicated region fallthrough
CT: control target
= control target key end

     0   :  { %s1229_s0 = inlined_call_operand.vmem [shape: f32[2,8,4], index: 0, kind: input, shape index: {}]   ;;  %s1230_s1 = inlined_call_operand.vmem [shape: f32[4,32], index: 1, kind: input, shape index: {}]   ;;  %s1231_s2 = inlined_call_operand.vmem [shape: f32[1,32], index: 2, kind: input, shape index: {}]   ;;  %s1232_s3 = inlined_call_operand.vmem [shape: f32[2,1,32], index: 3, kind: input, shape index: {}]   ;;  %s1233_s4 = inlined_call_operand.vmem [shape: f32[2,1,32], index: 4, kind: input, shape index: {}]   ;;  %s1234_s5 = inlined_call_operand.hbm [shape: f32[2,8,8,32], index: 5, kind: input, shape index: {}]   ;;  %s1235_s6 = inlined_call_operand.hbm [shape: f32[2,32,32], index: 6, kind: input, shape index: {}]   ;;  %s1236_s7 = inlined_call_operand.vmem [shape: f32[2,1,32], index: 7, kind: input, shape index: {}]   ;;  %s1237_s8 = inlined_call_operand.vmem [shape: f32[32,10], index: 8, kind: input, shape index: {}]   ;;  %s1238_s9 = inlined_call_operand.hbm [shape: f32[2,8,10], index: 9, kind: output, shape index: {}]  }
   0x1   :  { %1239 = sst [smem:[#allocation11_spill]] %s1229_s0 }
   0x2   :  { %14 = vsyncpa [#allocation3], 0 }
   0x3   :  { %15 = vsyncpa [#allocation6], 0 }
   0x4   :  { %16 = vsyncpa [#allocation4], 0 }
   0x5   :  { %18 = vsyncpa [#allocation4 + $0x1], 0  ;;  %s1060_s30 = smov 0   ;;  %s1062_s10 = smov 0  }
   0x6   :  { %s1064_s11 = smov 0   ;;  %s1066_s12 = smov 0  }
   0x7 LB: > { %s1081_s13 = sadd.s32 4294967295, %s1003_s12   ;;  %s765_s14 = sadd.s32 4294967294, %s1003_s12   ;;  %s1003_s12 = sphi %s1066_s12, %s1247_s12   ;;  %s999_s11 = sphi %s1064_s11, %s1246_s11   ;;  %s995_s10 = sphi %s1062_s10, %s1245_s10   ;;  %s991_s30 = sphi %s1060_s30, %s1244_s30  }
   0x8   : > { %s1085_s15 = sadd.s32 1, %s1003_s12   ;;  %s225_s16 = sadd.s32 1, %s999_s11 }
   0x9   : > { %s222_s17 = ssub.s32 %s1003_s12, %s1085_s15  ;;  %p235_p0 = scmp.ne.s32.totalorder %s999_s11, %s995_s10 }
   0xa   : > { %p223_p1 = scmp.eq.s32.totalorder %s222_s17, 0  ;;  %p236_p2 = scmp.eq.s32.totalorder %s1081_s13, 1 }
   0xb   : > { %p241_p3 = scmp.ne.s32.totalorder %s995_s10, %s991_s30  ;;  %p242_p4 = scmp.eq.s32.totalorder %s765_s14, 1 }
   0xc   : > { %s1096_s18 = scalar_select %p223_p1, %s999_s11, %s225_s16  }
   0xd   : > { %p1098_p5 = por %p236_p2, %p235_p0  ;;  %p1102_p6 = por %p242_p4, %p241_p3 }
   0xe   : > { %p766_p7 = scmp.ge.s32.totalorder %s1003_s12, 1  ;;  %p249_p8 = scmp.lt.s32.totalorder %s1003_s12, 3 }
   0xf   : > { %p810_p9 = scmp.eq.s32.totalorder %s1081_s13, 0  ;;  %s272_s24 = sshll.u32 %s1234_s5, 4  ;;  %s273_s24 = int_to_ptr.hbm [resolvable:$true] %s272_s24 }
  0x10   : > { %p1109_p10 = pnand %p766_p7, %p249_p8  ;;  %s1005_s25 = smov [#allocation2]  }
  0x11   : > { %s274_s26 = sshll.u32 %s1005_s25, 4  ;;  %s286_s29 = sshll.u32 %s1235_s6, 4  ;;  %s275_s26 = int_to_ptr.vmem [resolvable:$true] %s274_s26  ;;  %s287_s29 = int_to_ptr.hbm [resolvable:$true] %s286_s29 }
  0x12   : > { %p799_p11 = pneg %p1109_p10  ;;  %s1006_s14 = smov 128  }
  0x13   : > { %s1007_s16 = smov 8   ;;  %s1008_s17 = smov [#allocation5]  }
  0x14   : > { %p800_p12 = pnand %p810_p9, %p799_p11  ;;  %s288_s22 = sshll.u32 %s1008_s17, 4  ;;  %s289_s22 = int_to_ptr.vmem [resolvable:$true] %s288_s22 }
  0x15   : > { %317 = sbr.rel (%p1109_p10) target bundleno = 1198 (0x4ae), region = 56 }
  0x16   : > { %802 = dma.hbm_to_vmem [thread:$0]  (!%p800_p12), %s273_s24, 2048, %s275_s26, [#allocation3], %s1006_s14, %s1006_s14, %s1007_s16  }
  0x17   : > { %805 = dma.hbm_to_vmem [thread:$0]  (!%p800_p12), %s287_s29, 1024, %s289_s22, [#allocation6], %s1006_s14, %s1006_s14, %s1007_s16  }
  0x1a   : > { %978 = dma.done.wait (%p810_p9), [#allocation3], 2048  }
  0x1b   : > { %980 = vsyncadd (%p810_p9), [#allocation3], 4294965248 }
  0x1c   : > { %982 = dma.done.wait (%p810_p9), [#allocation6], 1024  }
  0x1d   : > { %984 = vsyncadd (%p810_p9), [#allocation6], 4294966272  ;;  %p358_p13 = scmp.lt.s32.totalorder %s1081_s13, 1  ;;  %vm372_vm0 = vcmask 1043456   ;;  %s1243_s0 = sld [smem:[#allocation11_spill]]  ;;  %vm368_vm1 = vcmask 31744  }
  0x1e   : > { %v363_v0 = vld [vmem:[%s1230_s1] sm:$0xf]  ;;  %vm396_vm2 = vcmask 261120   ;;  %v1009_v6 = vmov 32.0   ;;  %v470_v18 = vld [vmem:[#allocation5 + $0x18] sm:$0xff]  ;;  %v469_v19 = vld [vmem:[#allocation5 + $0x10] sm:$0xff] }
  0x1f   : > { %s359_s23 = scalar_select %p358_p13, %s1081_s13, 1  ;;  %775 = vmatpush.msk.msra.mxu0 %vm372_vm0, %v363_v0  ;;  %v852_v2 = vld [vmem:[%s1231_s2] ss:$0 sm:$0xff]  ;;  %859 = vrcp.f32 %v1009_v6  ;;  %490 = vmatpush.msra.mxu1 %v470_v18  ;;  %v468_v20 = vld [vmem:[#allocation5 + $0x8] sm:$0xff]  ;;  %v438_v42 = vld [vmem:[#allocation2 + $0x10] sm:$0xff] }
  0x20   : > { %v467_v21 = vld [vmem:[#allocation5] sm:$0xff]  ;;  %v437_v38 = vld [vmem:[#allocation2 + $0x8] sm:$0xff]  ;;  %v439_v46 = vld [vmem:[#allocation2 + $0x18] sm:$0xff]  ;;  %s355_s27 = sand.u32 1, %s995_s10   ;;  %s786_s29 = sshll.u32 %s1081_s13, 3 }
  0x21   : > { %s774_s24 = sshll.u32 %s359_s23, 3  ;;  %491 = vmatpush.msra.mxu1 %v469_v19  ;;  %v853_v31 = vld [vmem:[%s1232_s3] ss:$0 sm:$0xff]  ;;  %v441_v54 = vld [vmem:[#allocation2 + $0x28] sm:$0xff]  ;;  %v442_v58 = vld [vmem:[#allocation2 + $0x30] sm:$0xff]  ;;  %s773_s28 = sshll.u32 %s355_s27, 3 }
  0x22   : > { %v854_v33 = vld [vmem:[%s1233_s4] ss:$0 sm:$0xff]  ;;  %v443_v62 = vld [vmem:[#allocation2 + $0x38] sm:$0xff]  ;;  %s679_s17 = scalar_lea.hbm %s1238_s9, %s786_s29  ;;  %s357_s22 = scalar_lea.vmem [#allocation7], %s773_s28 }
  0x23   : > { %s361_s26 = scalar_lea.vmem %s1243_s0, %s774_s24  ;;  %492 = vmatpush.msra.mxu1 %v468_v20  ;;  %v436_v37 = vld [vmem:[#allocation2] sm:$0xff]  ;;  %s681_s23 = sshll.u32 %s357_s22, 4  ;;  %s682_s23 = int_to_ptr.vmem [resolvable:$true] %s681_s23 }
  0x24   : > { %v362_v1 = vld [vmem:[%s361_s26] sm:$0xff]  ;;  %s683_s24 = sshll.u32 %s679_s17, 4  ;;  %s669_s21 = scalar_lea.sflag [#allocation4], %s355_s27  ;;  %s684_s24 = int_to_ptr.hbm [resolvable:$true] %s683_s24 }
  0x25   : > { %776 = vmatmul.msk.f32.vlgmr.msra.gmra.mxu0 %vm368_vm1, %v362_v1  ;;  %v860_v7 = vpop.eup %859  ;;  %493 = vmatpush.msra.mxu1 %v467_v21  ;;  %v440_v50 = vld [vmem:[#allocation2 + $0x20] sm:$0xff]  ;;  %s947_s25 = sshra.s32 %s684_s24, 4  ;;  %s953_s29 = scalar_lea.hbm %s1238_s9, 16  ;;  %s948_s25 = int_to_ptr.hbm [resolvable:$true] %s947_s25 }
  0x26   : > { %v401_v8 = vmul.f32 32.0, %v860_v7  ;;  %vm405_vm3 = vweird.f32 %v860_v7  ;;  %s949_s26 = scalar_lea.hbm %s948_s25, 8  ;;  %p954_p3 = scmp.lt.s32.totalorder %s948_s25, %s1238_s9 }
  0x27   : > { %p950_p0 = scmp.ne.s32.totalorder %s948_s25, %s949_s26  ;;  %p955_p4 = scmp.lt.s32.totalorder %s953_s29, %s949_s26 }
  0x28   : > { %v402_v9 = vsub.f32 1.0, %v401_v8 }
  0x29   : > { %p951_p1 = pnand %p950_p0, %p1098_p5  ;;  %p956_p7 = por %p955_p4, %p954_p3 }
  0x2a   : > { %v403_v10 = vmul.f32 %v860_v7, %v402_v9 }
  0x2b   : > { %p952_p2 = pneg %p951_p1 }
  0x2c   : > { %v404_v11 = vadd.f32 %v860_v7, %v403_v10 }
  0x2d   : > { %p957_p8 = pnand %p956_p7, %p952_p2 }
  0x2e   : > { %v1148_v12 = vsel %vm405_vm3, %v860_v7, %v404_v11  ;;  %vm666_vm3 = vcmask 80896  }
  0xa2   : > { %v393_v3 = vpop.f32.mrf.mxu0 }
  0xa3   : > { %v1144_v4 = vadd.f32 %v852_v2, %v393_v3 }
  0xa5   : > { %v397_v5 = vsel %vm396_vm2, %v1144_v4, 0.0 }
  0xa6   : > { %398 = vadd.xlane.f32.xlu0 %v397_v5  ;;  %v855_v5 = vld [vmem:[%s1236_s7] ss:$0 sm:$0xff] }
 0x119   : > { %v399_v13 = vpop.xlane.xlu0 %398 }
 0x11a   : > { %v407_v14 = vmul.f32 %v1148_v12, %v399_v13 }
 0x11c   : > { %v408_v15 = vsub.f32 %v1144_v4, %v407_v14 }
 0x11e   : > { %v409_v16 = vmul.f32 %v408_v15, %v408_v15 }
 0x120   : > { %v410_v17 = vsel %vm396_vm2, %v409_v16, 0.0 }
 0x121   : > { %411 = vadd.xlane.f32.xlu0 %v410_v17 }
 0x194   : > { %v412_v22 = vpop.xlane.xlu0 %411 }
 0x195   : > { %v413_v23 = vmul.f32 %v412_v22, %v1148_v12 }
 0x197   : > { %v414_v24 = vadd.f32 1e-05, %v413_v23 }
 0x199   : > { %861 = vrsqrt.f32 %v414_v24  ;;  %vm421_vm5 = vweird.f32 %v414_v24 }
 0x19f   : > { %v862_v25 = vpop.eup %861 }
 0x1a0   : > { %v416_v26 = vmul.f32 %v862_v25, %v414_v24  ;;  %vm422_vm4 = vweird.f32 %v862_v25 }
 0x1a1   : > { %vm423_vm6 = vmor %vm421_vm5, %vm422_vm4 }
 0x1a2   : > { %v417_v27 = vmul.f32 %v862_v25, %v416_v26 }
 0x1a4   : > { %v418_v28 = vmul.f32 0.5, %v417_v27 }
 0x1a6   : > { %v419_v29 = vsub.f32 1.5, %v418_v28 }
 0x1a8   : > { %v420_v30 = vmul.f32 %v862_v25, %v419_v29 }
 0x1aa   : > { %v424_v32 = vsel %vm423_vm6, %v862_v25, %v420_v30  ;;  %v589_v30 = vld [vmem:[#allocation5 + $0x38] sm:$0xff] }
 0x1ab   : > { %v425_v34 = vmul.f32 %v424_v32, %v408_v15  ;;  %610 = vmatpush.msra.mxu2 %v589_v30  ;;  %v587_v32 = vld [vmem:[#allocation5 + $0x28] sm:$0xff] }
 0x1ad   : > { %v430_v35 = vmul.f32 %v853_v31, %v425_v34  ;;  %v588_v31 = vld [vmem:[#allocation5 + $0x30] sm:$0xff] }
 0x1ae   : > { %611 = vmatpush.msra.mxu2 %v588_v31 }
 0x1af   : > { %v435_v36 = vadd.f32 %v854_v33, %v430_v35 }
 0x1b0   : > { %612 = vmatpush.msra.mxu2 %v587_v32 }
 0x1b1   : > { %v444_v39 = vperm.slane %v435_v36, 0  ;;  %v446_v40 = vperm.slane %v435_v36, 1  ;;  %v449_v41 = vperm.slane %v435_v36, 2  ;;  %v452_v45 = vperm.slane %v435_v36, 3 }
 0x1b2   : > { %v455_v49 = vperm.slane %v435_v36, 4  ;;  %v458_v53 = vperm.slane %v435_v36, 5  ;;  %v461_v57 = vperm.slane %v435_v36, 6  ;;  %v464_v61 = vperm.slane %v435_v36, 7 }
 0x1b3   : > { %v445_v43 = vmul.f32 %v444_v39, %v436_v37  ;;  %v447_v44 = vmul.f32 %v446_v40, %v437_v38  ;;  %v450_v48 = vmul.f32 %v449_v41, %v438_v42  ;;  %v453_v52 = vmul.f32 %v452_v45, %v439_v46  ;;  %v856_v42 = vld [vmem:[%s1232_s3 + $0x1] ss:$0 sm:$0xff] }
 0x1b4   : > { %v456_v56 = vmul.f32 %v455_v49, %v440_v50  ;;  %v459_v60 = vmul.f32 %v458_v53, %v441_v54  ;;  %v462_v0 = vmul.f32 %v461_v57, %v442_v58  ;;  %v465_v2 = vmul.f32 %v464_v61, %v443_v62 }
 0x1b5   : > { %v448_v47 = vadd.f32 %v447_v44, %v445_v43 }
 0x1b7   : > { %v451_v51 = vadd.f32 %v450_v48, %v448_v47  ;;  %v554_v47 = vld [vmem:[#allocation2 + $0x40] sm:$0xff]  ;;  %v555_v48 = vld [vmem:[#allocation2 + $0x48] sm:$0xff] }
 0x1b9   : > { %v454_v55 = vadd.f32 %v453_v52, %v451_v51  ;;  %v556_v52 = vld [vmem:[#allocation2 + $0x50] sm:$0xff] }
 0x1bb   : > { %v457_v59 = vadd.f32 %v456_v56, %v454_v55  ;;  %v557_v56 = vld [vmem:[#allocation2 + $0x58] sm:$0xff] }
 0x1bd   : > { %v460_v63 = vadd.f32 %v459_v60, %v457_v59  ;;  %v558_v60 = vld [vmem:[#allocation2 + $0x60] sm:$0xff] }
 0x1bf   : > { %v463_v1 = vadd.f32 %v462_v0, %v460_v63  ;;  %v559_v0 = vld [vmem:[#allocation2 + $0x68] sm:$0xff] }
 0x1c1   : > { %v466_v3 = vadd.f32 %v465_v2, %v463_v1 }
 0x1c3   : > { %777 = vmatmul.msk.f32.vlgmr.msra.gmra.mxu1 %vm396_vm2, %v466_v3 }
 0x240   : > { %v495_v6 = vpop.f32.mrf.mxu1 }
 0x241   : > { %v496_v7 = vadd.f32 %v855_v5, %v495_v6  ;;  %v560_v5 = vld [vmem:[#allocation2 + $0x70] sm:$0xff] }
 0x243   : > { %v778_v8 = vmul.f32 -1.442695, %v496_v7 }
 0x245   : > { %863 = vpow2.f32 %v778_v8 }
 0x24b   : > { %v864_v9 = vpop.eup %863 }
 0x24c   : > { %v501_v10 = vadd.f32 1.0, %v864_v9  ;;  %v561_v9 = vld [vmem:[#allocation2 + $0x78] sm:$0xff] }
 0x24e   : > { %865 = vrcp.f32 %v501_v10  ;;  %v513_v15 = vand.u32 2147483648, %v501_v10  ;;  %v511_v17 = vand.u32 2147483647, %v501_v10  ;;  %vm507_vm8 = vweird.f32 %v501_v10 }
 0x250   : > { %v514_v19 = vor.u32 1.1754944e-38, %v513_v15  ;;  %vm512_vm10 = vcmp.eq.f32.partialorder %v511_v17, 8.507059e+37  ;;  %v858_v17 = vld [vmem:[%s1236_s7 + $0x1] ss:$0 sm:$0xff] }
 0x254   : > { %v866_v11 = vpop.eup %865 }
 0x255   : > { %v503_v13 = vmul.f32 %v866_v11, %v501_v10  ;;  %vm508_vm7 = vweird.f32 %v866_v11 }
 0x256   : > { %vm509_vm9 = vmor %vm507_vm8, %vm508_vm7 }
 0x257   : > { %v504_v14 = vsub.f32 1.0, %v503_v13 }
 0x259   : > { %v505_v16 = vmul.f32 %v866_v11, %v504_v14 }
 0x25b   : > { %v506_v18 = vadd.f32 %v866_v11, %v505_v16  ;;  %v642_v16 = vld [vmem:[%s1237_s8 + $0x18] sm:$0xff] }
 0x25c   : > { %658 = vmatpush.msra.mxu3 %v642_v16 }
 0x25d   : > { %v510_v20 = vsel %vm509_vm9, %v866_v11, %v506_v18  ;;  %v641_v18 = vld [vmem:[%s1237_s8 + $0x10] sm:$0xff] }
 0x25e   : > { %v515_v21 = vsel %vm512_vm10, %v514_v19, %v510_v20  ;;  %659 = vmatpush.msra.mxu3 %v641_v18  ;;  %v640_v19 = vld [vmem:[%s1237_s8 + $0x8] sm:$0xff] }
 0x25f   : > { %v517_v22 = vmul.f32 %v515_v21, %v496_v7  ;;  %v639_v21 = vld [vmem:[%s1237_s8] sm:$0xff] }
 0x260   : > { %660 = vmatpush.msra.mxu3 %v640_v19 }
 0x261   : > { %v1165_v23 = vadd.f32 %v517_v22, %v1144_v4  ;;  %v586_v4 = vld [vmem:[#allocation5 + $0x20] sm:$0xff] }
 0x262   : > { %613 = vmatpush.msra.mxu2 %v586_v4  ;;  %661 = vmatpush.msra.mxu3 %v639_v21 }
 0x263   : > { %v519_v24 = vsel %vm396_vm2, %v1165_v23, 0.0 }
 0x264   : > { %520 = vadd.xlane.f32.xlu1 %v519_v24 }
 0x2d7   : > { %v521_v25 = vpop.xlane.xlu1 %520 }
 0x2d8   : > { %v522_v26 = vmul.f32 %v521_v25, %v1148_v12 }
 0x2da   : > { %v523_v27 = vsub.f32 %v1165_v23, %v522_v26 }
 0x2dc   : > { %v524_v28 = vmul.f32 %v523_v27, %v523_v27 }
 0x2de   : > { %v525_v29 = vsel %vm396_vm2, %v524_v28, 0.0 }
 0x2df   : > { %526 = vadd.xlane.f32.xlu1 %v525_v29 }
 0x352   : > { %v527_v33 = vpop.xlane.xlu1 %526 }
 0x353   : > { %v528_v34 = vmul.f32 %v527_v33, %v1148_v12  ;;  %v857_v12 = vld [vmem:[%s1233_s4 + $0x1] ss:$0 sm:$0xff] }
 0x355   : > { %v529_v35 = vadd.f32 1e-05, %v528_v34 }
 0x357   : > { %867 = vrsqrt.f32 %v529_v35  ;;  %vm536_vm12 = vweird.f32 %v529_v35 }
 0x35d   : > { %v868_v36 = vpop.eup %867 }
 0x35e   : > { %v531_v37 = vmul.f32 %v868_v36, %v529_v35  ;;  %vm537_vm11 = vweird.f32 %v868_v36 }
 0x35f   : > { %vm538_vm13 = vmor %vm536_vm12, %vm537_vm11 }
 0x360   : > { %v532_v38 = vmul.f32 %v868_v36, %v531_v37 }
 0x362   : > { %v533_v39 = vmul.f32 0.5, %v532_v38 }
 0x364   : > { %v534_v40 = vsub.f32 1.5, %v533_v39 }
 0x366   : > { %v535_v41 = vmul.f32 %v868_v36, %v534_v40 }
 0x368   : > { %v539_v43 = vsel %vm538_vm13, %v868_v36, %v535_v41 }
 0x369   : > { %v540_v44 = vmul.f32 %v539_v43, %v523_v27 }
 0x36b   : > { %v546_v45 = vmul.f32 %v856_v42, %v540_v44 }
 0x36d   : > { %v552_v46 = vadd.f32 %v857_v12, %v546_v45 }
 0x36f   : > { %v562_v49 = vperm.slane %v552_v46, 0  ;;  %v564_v50 = vperm.slane %v552_v46, 1  ;;  %v567_v51 = vperm.slane %v552_v46, 2  ;;  %v570_v55 = vperm.slane %v552_v46, 3 }
 0x370   : > { %v573_v59 = vperm.slane %v552_v46, 4  ;;  %v576_v63 = vperm.slane %v552_v46, 5  ;;  %v579_v3 = vperm.slane %v552_v46, 6  ;;  %v582_v8 = vperm.slane %v552_v46, 7 }
 0x371   : > { %v563_v53 = vmul.f32 %v562_v49, %v554_v47  ;;  %v565_v54 = vmul.f32 %v564_v50, %v555_v48  ;;  %v568_v58 = vmul.f32 %v567_v51, %v556_v52  ;;  %v571_v62 = vmul.f32 %v570_v55, %v557_v56 }
 0x372   : > { %v574_v2 = vmul.f32 %v573_v59, %v558_v60  ;;  %v577_v7 = vmul.f32 %v576_v63, %v559_v0  ;;  %v580_v11 = vmul.f32 %v579_v3, %v560_v5  ;;  %v583_v14 = vmul.f32 %v582_v8, %v561_v9 }
 0x373   : > { %v566_v57 = vadd.f32 %v565_v54, %v563_v53 }
 0x375   : > { %v569_v61 = vadd.f32 %v568_v58, %v566_v57 }
 0x377   : > { %v572_v1 = vadd.f32 %v571_v62, %v569_v61 }
 0x379   : > { %v575_v6 = vadd.f32 %v574_v2, %v572_v1 }
 0x37b   : > { %v578_v10 = vadd.f32 %v577_v7, %v575_v6 }
 0x37d   : > { %v581_v13 = vadd.f32 %v580_v11, %v578_v10 }
 0x37f   : > { %v584_v15 = vadd.f32 %v583_v14, %v581_v13 }
 0x381   : > { %782 = vmatmul.msk.f32.vlgmr.msra.gmra.mxu2 %vm396_vm2, %v584_v15 }
 0x404   : > { %v615_v20 = vpop.f32.mrf.mxu2 }
 0x405   : > { %v616_v22 = vadd.f32 %v858_v17, %v615_v20 }
 0x407   : > { %v783_v24 = vmul.f32 -1.442695, %v616_v22 }
 0x409   : > { %869 = vpow2.f32 %v783_v24 }
 0x40f   : > { %v870_v25 = vpop.eup %869 }
 0x410   : > { %v621_v26 = vadd.f32 1.0, %v870_v25 }
 0x412   : > { %871 = vrcp.f32 %v621_v26  ;;  %v633_v30 = vand.u32 2147483648, %v621_v26  ;;  %v631_v32 = vand.u32 2147483647, %v621_v26  ;;  %vm627_vm15 = vweird.f32 %v621_v26 }
 0x414   : > { %v634_v33 = vor.u32 1.1754944e-38, %v633_v30  ;;  %vm632_vm1 = vcmp.eq.f32.partialorder %v631_v32, 8.507059e+37 }
 0x418   : > { %v872_v27 = vpop.eup %871 }
 0x419   : > { %v623_v28 = vmul.f32 %v872_v27, %v621_v26  ;;  %vm628_vm14 = vweird.f32 %v872_v27 }
 0x41a   : > { %vm629_vm0 = vmor %vm627_vm15, %vm628_vm14 }
 0x41b   : > { %v624_v29 = vsub.f32 1.0, %v623_v28 }
 0x41d   : > { %v625_v31 = vmul.f32 %v872_v27, %v624_v29 }
 0x41f   : > { %v626_v4 = vadd.f32 %v872_v27, %v625_v31 }
 0x421   : > { %v630_v34 = vsel %vm629_vm0, %v872_v27, %v626_v4 }
 0x422   : > { %v635_v35 = vsel %vm632_vm1, %v634_v33, %v630_v34 }
 0x423   : > { %v637_v36 = vmul.f32 %v635_v35, %v616_v22 }
 0x425   : > { %v638_v37 = vadd.f32 %v637_v36, %v1165_v23 }
 0x427   : > { %784 = vmatmul.msk.f32.vlgmr.msra.gmra.mxu3 %vm396_vm2, %v638_v37 }
 0x4aa   : > { %v663_v38 = vpop.f32.mrf.mxu3 }
 0x4ab   : > { %667 = vst.msk [vmem:[%s357_s22] sm:$0xff] %vm666_vm3, %v663_v38 }
 0x4ac   : > { %960 = shalt.err (!%p957_p8)
}
 0x4ad   : > { %797 = dma.vmem_to_hbm [thread:$0]  (%p1098_p5), %s682_s23, 128, %s684_s24, %s669_s21  }
 0x4ae PF: > { %p814_p9 = scmp.ge.s32.totalorder %s1003_s12, 2  ;;  %s695_s27 = sand.u32 1, %s991_s30  }
 0x4af   : > { %s696_s0 = scalar_lea.sflag [#allocation4], %s695_s27 }
 0x4b0   : > { %p807_p10 = pnand %p814_p9, %p1102_p6 }
 0x4b2   : > { %p808_p11 = pneg %p807_p10 }
 0x4b4   : > { %986 = dma.done.wait (%p808_p11), %s696_s0, 128  }
 0x4b5   : > { %988 = vsyncadd (%p808_p11), %s696_s0, 4294967168  ;;  %p21_p12 = scmp.ge.s32.totalorder %s1085_s15, 4   ;;  %s1244_s30 = smov %s995_s10 }
 0x4b6   : > { %s1245_s10 = smov %s999_s11  ;;  %s1246_s11 = smov %s1096_s18 }
 0x4b7   : > { %s1247_s12 = smov %s1085_s15  ;;  %23 = sbr.rel (!%p21_p12) target bundleno = 7 (0x7), region = 105 }
 0x4bc   :  { %702 = vsyncpa [#allocation3], 1 }
 0x4bd   :  { %704 = vsyncpa [#allocation3 + $0x1], 1 }
 0x4be   :  { %705 = vsyncpa [#allocation6], 1 }
 0x4bf   :  { %706 = vsyncpa [#allocation4], 1 }
 0x4c0   :  { %708 = vsyncpa [#allocation4 + $0x1], 1 }

</bundles_post_ra>
